<compile_context>
chip_gen: v6e
topology: v6e:2x2x1
jax: 0.10.0
libtpu: 0.0.40
codegen_flags: <defaults>
</compile_context>

<pallas_src>
import jax
import jax.numpy as jnp
from jax.experimental import pallas as pl
from jax.experimental.pallas import tpu as pltpu


# ---------------------------------------------------------------------------
# Small helpers
# ---------------------------------------------------------------------------
def _round_up(x: int, m: int) -> int:
    return ((x + m - 1) // m) * m


def _cdiv(a: int, b: int) -> int:
    return (a + b - 1) // b


def _sublane(dtype) -> int:
    # Sublane packing multiple: 8 for 4-byte, 16 for 2-byte, 32 for 1-byte.
    return max(8, 32 // jnp.dtype(dtype).itemsize)


# ---------------------------------------------------------------------------
# Hardware detection (generation, core count, VMEM capacity)
# ---------------------------------------------------------------------------
def _hw_info():
    kind = ""
    try:
        kind = jax.devices()[0].device_kind.lower()
    except Exception:
        pass

    vmem = None
    try:
        vmem = int(pltpu.get_tpu_info().vmem_capacity_bytes)
    except Exception:
        vmem = None
    if vmem is None or vmem <= 0:
        if "v7" in kind:
            vmem = 64 << 20
        elif any(t in kind for t in ("v4", "v5", "v6")):
            vmem = 128 << 20
        else:
            vmem = 64 << 20  # unknown: assume the smallest (v7x-class) VMEM

    if "v7" in kind:
        gen, cores = "v7x", 2
    elif "v6" in kind:
        gen, cores = "v6e", 1
    elif "v5p" in kind:
        gen, cores = "v5e", 2
    elif "v5" in kind:
        gen, cores = "v5e", 1
    elif "v4" in kind:
        gen, cores = None, 2
    else:
        gen, cores = None, 1
    return gen, cores, vmem


def _tile_targets(gen, compute_dtype, vmem_bytes):
    """Dtype- and generation-aware (tm, tn, tk) targets + scoped VMEM limit."""
    narrow = jnp.dtype(compute_dtype).itemsize <= 2  # bf16 / f16
    if gen == "v7x":
        tm, tn, tk = (1024, 1024, 512) if narrow else (512, 512, 512)
    elif gen == "v6e":
        tm, tn, tk = (1024, 1024, 512) if narrow else (512, 512, 1024)
    elif gen == "v5e":
        tm, tn, tk = (512, 512, 1024)          # already at the HBM roofline
    else:
        tm, tn, tk = (512, 512, 512) if narrow else (256, 256, 512)
    vmem_limit = min(int(vmem_bytes * 0.75), 100 << 20)
    return tm, tn, tk, vmem_limit


def _choose_tiles(M, N, K, a_bytes, b_bytes, out_bytes,
                  tm_t, tn_t, tk_t, vmem_limit, sub_m, cores):
    # Dims that fit the target become a single full-dim block (no padding,
    # no (8,128) divisibility requirement); larger dims tile at the target.
    tm = M if M <= tm_t else tm_t
    tn = N if N <= tn_t else tn_t
    tk = K if K <= tk_t else tk_t

    # 2 TensorCores: expose >=2 "parallel" output blocks whenever there is a
    # real multi-step K reduction, so both cores get work.
    if cores >= 2 and tk < K and _cdiv(M, tm) * _cdiv(N, tn) < 2:
        if N >= 256:
            tn = _round_up(_cdiv(N, 2), 128)
        elif M >= 2 * sub_m:
            tm = _round_up(_cdiv(M, 2), sub_m)

    budget = int(vmem_limit * 0.8)  # headroom for the compiler's own scratch

    def footprint(tm_, tn_, tk_):
        use_acc = (out_bytes != 4) and (tk_ < K)
        inputs = 2 * (tm_ * tk_ * a_bytes + tk_ * tn_ * b_bytes)   # dbl-buffered
        outputs = 2 * tm_ * tn_ * out_bytes
        acc = tm_ * tn_ * 4 if use_acc else 0
        return inputs + outputs + acc

    # Shrink tk, then tn, then tm, keeping alignment, until it fits.
    while footprint(tm, tn, tk) > budget:
        if tk > 128:
            tk = max(128, _round_up(tk // 2, 128))
        elif tn > 128:
            tn = max(128, _round_up(tn // 2, 128))
        elif tm > sub_m:
            tm = max(sub_m, _round_up(tm // 2, sub_m))
        else:
            break
    return tm, tn, tk


# ---------------------------------------------------------------------------
# Kernel factory
# ---------------------------------------------------------------------------
def _make_kernel(compute_dtype, multi_k, use_acc, k_rem, tk):
    """k_rem > 0 => only the first k_rem rows/cols of the last K block are valid."""

    def _load(a_ref, b_ref):
        a = a_ref[...].astype(compute_dtype)
        b = b_ref[...].astype(compute_dtype)
        if k_rem:
            valid = jnp.where(pl.program_id(2) == pl.num_programs(2) - 1,
                              k_rem, tk)
            # Select (not multiply) so stale/NaN data in the out-of-bounds
            # region of the boundary block cannot contaminate the result.
            a = jnp.where(
                jax.lax.broadcasted_iota(jnp.int32, a.shape, 1) < valid,
                a, jnp.zeros_like(a))
            b = jnp.where(
                jax.lax.broadcasted_iota(jnp.int32, b.shape, 0) < valid,
                b, jnp.zeros_like(b))
        return a, b

    if not multi_k:
        # Single K block (tk == K): direct store, no accumulator, no pl.when.
        def kernel(a_ref, b_ref, o_ref):
            a, b = _load(a_ref, b_ref)
            o_ref[...] = jnp.dot(
                a, b, preferred_element_type=jnp.float32).astype(o_ref.dtype)
        return kernel

    if use_acc:
        # Narrow output dtype: accumulate in f32 scratch, cast once at the end.
        def kernel(a_ref, b_ref, o_ref, acc_ref):
            @pl.when(pl.program_id(2) == 0)
            def _():
                acc_ref[...] = jnp.zeros_like(acc_ref)

            a, b = _load(a_ref, b_ref)
            acc_ref[...] += jnp.dot(a, b, preferred_element_type=jnp.float32)

            @pl.when(pl.program_id(2) == pl.num_programs(2) - 1)
            def _():
                o_ref[...] = acc_ref[...].astype(o_ref.dtype)
        return kernel

    # f32 output: accumulate directly into the resident output block.
    def kernel(a_ref, b_ref, o_ref):
        @pl.when(pl.program_id(2) == 0)
        def _():
            o_ref[...] = jnp.zeros_like(o_ref)

        a, b = _load(a_ref, b_ref)
        o_ref[...] += jnp.dot(a, b, preferred_element_type=jnp.float32)
    return kernel


# ---------------------------------------------------------------------------
# Wrapper: forward-pass equivalent of _QATMatMul.forward(a, b) == a @ b
# ---------------------------------------------------------------------------
def qat_matmul(a: jax.Array, b: jax.Array) -> jax.Array:
    if a.ndim != 2 or b.ndim != 2:
        raise NotImplementedError("2-D matmul only")  # TODO(synk): batched matmul
    M, K = a.shape
    K2, N = b.shape
    if K != K2:
        raise ValueError("inner dimensions must match")
    for x in (a, b):
        if (not jnp.issubdtype(x.dtype, jnp.floating)
                or jnp.dtype(x.dtype).itemsize > 4):
            raise NotImplementedError("only float32 / bfloat16 / float16 inputs")

    # torch.matmul promotion; the widening cast happens per-block in-kernel so
    # HBM traffic stays at each operand's native width.
    out_dtype = jnp.result_type(a.dtype, b.dtype)
    compute_dtype = out_dtype

    a_bytes = jnp.dtype(a.dtype).itemsize
    b_bytes = jnp.dtype(b.dtype).itemsize
    out_bytes = jnp.dtype(out_dtype).itemsize
    sub_m = _sublane(out_dtype)

    gen, cores, vmem_phys = _hw_info()
    tm_t, tn_t, tk_t, vmem_limit = _tile_targets(gen, compute_dtype, vmem_phys)
    tm, tn, tk = _choose_tiles(M, N, K, a_bytes, b_bytes, out_bytes,
                               tm_t, tn_t, tk_t, vmem_limit, sub_m, cores)

    gm, gn, gk = _cdiv(M, tm), _cdiv(N, tn), _cdiv(K, tk)
    k_rem = (K - (gk - 1) * tk) if (K % tk) else 0   # valid cols of last K block
    multi_k = gk > 1
    use_acc = multi_k and out_dtype != jnp.float32

    kernel = _make_kernel(compute_dtype, multi_k, use_acc, k_rem, tk)
    scratch = [pltpu.VMEM((tm, tn), jnp.float32)] if use_acc else []

    cost = pl.CostEstimate(
        flops=2 * M * N * K,
        transcendentals=0,
        # A is streamed gn times, B gm times; output written once.
        bytes_accessed=M * K * a_bytes * gn + K * N * b_bytes * gm
                       + M * N * out_bytes,
    )

    return pl.pallas_call(
        kernel,
        out_shape=jax.ShapeDtypeStruct((M, N), out_dtype),
        grid_spec=pltpu.PrefetchScalarGridSpec(
            num_scalar_prefetch=0,
            grid=(gm, gn, gk),
            in_specs=[
                pl.BlockSpec((tm, tk), lambda i, j, k: (i, k)),
                pl.BlockSpec((tk, tn), lambda i, j, k: (k, j)),
            ],
            out_specs=pl.BlockSpec((tm, tn), lambda i, j, k: (i, j)),
            scratch_shapes=scratch,
        ),
        compiler_params=pltpu.CompilerParams(
            dimension_semantics=("parallel", "parallel", "arbitrary"),
            vmem_limit_bytes=vmem_limit,
        ),
        cost_estimate=cost,
    )(a, b)


# ---------------------------------------------------------------------------
# Self-test
# ---------------------------------------------------------------------------
if __name__ == "__main__":
    key = jax.random.PRNGKey(0)
    k1, k2, k3, k4, k5, k6, k7, k8 = jax.random.split(key, 8)

    def check(a, b, tol=2e-2):
        out = jax.block_until_ready(qat_matmul(a, b))
        ref = jnp.matmul(a.astype(jnp.float32), b.astype(jnp.float32),
                         precision=jax.lax.Precision.HIGHEST)
        assert out.shape == ref.shape
        num = float(jnp.linalg.norm(out.astype(jnp.float32) - ref))
        den = float(jnp.linalg.norm(ref)) + 1e-12
        assert num / den < tol, f"rel err {num / den:.3e} for {a.shape}@{b.shape}"
        return out

    # Shapes implied by the QAT test module (seq=8, hidden=32, out=16):
    # single full-dim block, no padding, no slicing.
    a0 = jax.random.normal(k1, (8, 32), dtype=jnp.float32)
    b0 = jax.random.normal(k2, (32, 16), dtype=jnp.float32)
    out0 = check(a0, b0)
    assert out0.dtype == jnp.float32

    # Mixed precision (bf16 activations x f32 weights): bf16 stays bf16 in HBM.
    a1 = jax.random.normal(k3, (8, 32), dtype=jnp.bfloat16)
    b1 = jax.random.normal(k4, (32, 16), dtype=jnp.float32)
    out1 = check(a1, b1)
    assert out1.dtype == jnp.float32

    # Tiled path with a ragged (non-tile-multiple) M and unaligned N — still
    # no wrapper-side padding.
    a2 = jax.random.normal(k5, (520, 384), dtype=jnp.float32)
    b2 = jax.random.normal(k6, (384, 136), dtype=jnp.float32)
    check(a2, b2)

    # Multi-step K reduction with a masked final K block (K not a multiple of
    # the K tile on any generation).
    a3 = jax.random.normal(k7, (16, 1100), dtype=jnp.float32)
    b3 = jax.random.normal(k8, (1100, 24), dtype=jnp.float32)
    check(a3, b3)

    print("KERNEL_OK")
</pallas_src>

<mosaic_0001>
module attributes {stable_mosaic.version = 11 : i64} {
  func.func @kernel(%arg0: i32, %arg1: i32, %arg2: i32, %arg3: memref<8x32xf32, #tpu.memory_space<vmem>>, %arg4: memref<32x16xf32, #tpu.memory_space<vmem>>, %arg5: memref<8x16xf32, #tpu.memory_space<vmem>>) attributes {dimension_semantics = [#tpu.dimension_semantics<parallel>, #tpu.dimension_semantics<parallel>, #tpu.dimension_semantics<arbitrary>], iteration_bounds = array<i64: 1, 1, 1>, scalar_prefetch = 0 : i64, scratch_operands = 0 : i64, tpu.core_type = #tpu.core_type<tc>, window_params = [{transform_indices = @transform_0, window_bounds = array<i64: 8, 32>}, {transform_indices = @transform_1, window_bounds = array<i64: 32, 16>}, {transform_indices = @transform_2, window_bounds = array<i64: 8, 16>}]} {
    %c0 = arith.constant 0 : index
    %c0_0 = arith.constant 0 : index
    %0 = vector.load %arg3[%c0, %c0_0] : memref<8x32xf32, #tpu.memory_space<vmem>>, vector<8x32xf32>
    %c0_1 = arith.constant 0 : index
    %c0_2 = arith.constant 0 : index
    %1 = vector.load %arg4[%c0_1, %c0_2] : memref<32x16xf32, #tpu.memory_space<vmem>>, vector<32x16xf32>
    %cst = arith.constant dense<0.000000e+00> : vector<8x16xf32>
    %2 = tpu.matmul %0, %1, %cst {dimension_numbers = #tpu.dot_dimension_numbers<[1], [0], [0], [1], [0, 0, 1, 1], [], []>} : vector<8x32xf32>, vector<32x16xf32>, vector<8x16xf32> -> vector<8x16xf32>
    %c0_3 = arith.constant 0 : index
    %c0_4 = arith.constant 0 : index
    %3 = vector.load %arg5[%c0_3, %c0_4] : memref<8x16xf32, #tpu.memory_space<vmem>>, vector<8x16xf32>
    tpu.vector_store %arg5[%c0_3, %c0_4], %2 {strides = array<i32>} : memref<8x16xf32, #tpu.memory_space<vmem>>, vector<8x16xf32>,
    return
  }
  func.func @transform_0(%arg0: i32, %arg1: i32, %arg2: i32) -> (i32, i32) {
    %c0_i32 = arith.constant 0 : i32
    return %arg0, %arg2 : i32, i32
  }
  func.func @transform_1(%arg0: i32, %arg1: i32, %arg2: i32) -> (i32, i32) {
    %c0_i32 = arith.constant 0 : i32
    return %arg2, %arg1 : i32, i32
  }
  func.func @transform_2(%arg0: i32, %arg1: i32, %arg2: i32) -> (i32, i32) {
    %c0_i32 = arith.constant 0 : i32
    return %arg0, %arg1 : i32, i32
  }
}

</mosaic_0001>

<bundles_post_ra>
// kernel: tpu_custom_call.1
= control target key start
LH: loop header
LB: loop body
LE: loop exit
PB: predicated region body
PF: predicated region fallthrough
CT: control target
= control target key end

     0   :  { %v149_v1 = vmov 0.0   ;;  %vm150_vm0 = vmmov 0   ;;  %s185_s0 = inlined_call_operand.vmem [shape: f32[8,32], index: 0, kind: input, shape index: {}]   ;;  %s186_s1 = inlined_call_operand.vmem [shape: f32[32,16], index: 1, kind: input, shape index: {}]   ;;  %s187_s2 = inlined_call_operand.hbm [shape: f32[8,16], index: 2, kind: output, shape index: {}]  }
   0x1   :  { %v16_v0 = vld [vmem:[%s186_s1 + $0x18] sm:$0xff]  ;;  %113 = vmatprep.subr.mxu0 %v149_v1  ;;  %v15_v2 = vld [vmem:[%s186_s1 + $0x10] sm:$0xff]  ;;  %121 = vmatprep.mubr.msk.f32.mxu0 %vm150_vm0, %v149_v1 }
   0x2   :  { %7 = vsyncpa [#allocation3], 0  ;;  %114 = vmatpush3.msra.mxu0 %v16_v0  ;;  %v14_v3 = vld [vmem:[%s186_s1 + $0x8] sm:$0xff]  ;;  %v13_v4 = vld [vmem:[%s186_s1] sm:$0xff]  ;;  %vm17_vm1 = vcmask 261120   ;;  %s151_s19 = smov [#allocation2]  }
   0x3   :  { %115 = vmatprep.subr.mxu0 %v149_v1  ;;  %v12_v5 = vld [vmem:[%s185_s0] sm:$0xff]  ;;  %s99_s20 = sshll.u32 %s151_s19, 4  ;;  %vm91_vm2 = vcmask 130048   ;;  %s100_s20 = int_to_ptr.vmem [resolvable:$true] %s99_s20 }
   0x4   :  { %116 = vmatpush3.msra.mxu0 %v15_v2  ;;  %s127_s21 = scalar_lea.vmem %s100_s20, 128  ;;  %p132_p1 = scmp.lt.s32.totalorder %s100_s20, %s100_s20 }
   0x5   :  { %117 = vmatprep.subr.mxu0 %v149_v1  ;;  %p128_p0 = scmp.ne.s32.totalorder %s100_s20, %s127_s21  ;;  %p133_p2 = scmp.lt.s32.totalorder %s127_s21, %s127_s21 }
   0x6   :  { %118 = vmatpush3.msra.mxu0 %v14_v3 }
   0x7   :  { %119 = vmatprep.subr.mxu0 %v149_v1  ;;  %p134_p3 = por %p133_p2, %p132_p1 }
   0x8   :  { %120 = vmatpush3.msra.mxu0 %v13_v4 }
   0x9   :  { %122 = vmatmul.mubr.msk.f32.vlgmr.msra.gmra.mxu0 %vm17_vm1, %v12_v5  ;;  %p135_p4 = pnand %p134_p3, %p128_p0 }
  0xc9   :  { %v87_v6 = vpop.f32.mrf.mxu0 }
  0xca   :  { %92 = vst.msk [vmem:[#allocation2] sm:$0xff] %vm91_vm2, %v87_v6 }
  0xcb   :  { %v123_v7 = vpop.f32.mrf.mxu0 }
  0xcc   :  { %138 = shalt.err (!%p135_p4)
}
  0xcd   :  { %102 = dma.vmem_to_hbm [thread:$0]  %s100_s20, 128, %s187_s2, [#allocation3]  }
  0xce   :  { %147 = dma.done.wait [#allocation3], 128  }
  0xcf   :  { %148 = vsyncadd [#allocation3], 4294967168 }
  0xd0   :  { %106 = vsyncpa [#allocation3], 1 }

</bundles_post_ra>
